<compile_context>
chip_gen: v7x
topology: tpu7x:2x2x1
jax: 0.10.0
libtpu: 0.0.40
codegen_flags: <defaults>
</compile_context>

<pallas_src>
import numpy as np
import jax
import jax.numpy as jnp
from jax import lax
from jax.experimental import pallas as pl
from jax.experimental.pallas import tpu as pltpu


def _gaussian_taps(window: int):
    """Same construction as gaussian_smoothing.gaussian(): 2*window+1 taps."""
    x = np.arange(-window, window + 1)
    phi_g = np.exp(-x / 0.5)
    phi_g = phi_g / phi_g.sum()
    return [float(v) for v in phi_g]  # length 2*window + 1


def make_gaussian_smoothing(window: int, K: int, R: int, dtype=jnp.float32):
    taps = _gaussian_taps(window)   # static Python constants baked into kernel
    L = K * R                       # flattened (lane) length

    def kernel(x_ref, out_ref):
        # x_ref / out_ref: (1, L) == row-major flattening of (K, R).
        # out[k*R + r] = sum_d taps[d+window] * x[(k+d)*R + r], 0 outside [0,K)
        xf = x_ref[...].astype(jnp.float32)                # hoisted cast (once)
        lane = lax.broadcasted_iota(jnp.int32, (1, L), 1)  # flat index l

        terms = []
        for d in range(-window, window + 1):
            w_d = taps[d + window]
            if d == 0:
                terms.append(w_d * xf)
                continue
            # Bring x[l + d*R] to lane l via an XLU lane rotation; the wrapped
            # lanes are exactly the conv2d zero-padding region -> mask them.
            shifted = pltpu.roll(xf, (-d * R) % L, 1)
            if d > 0:
                valid = lane < (L - d * R)   # requires k + d <= K - 1
            else:
                valid = lane >= (-d * R)     # requires k + d >= 0
            terms.append(w_d * jnp.where(valid, shifted, 0.0))

        # Pairwise (tree) reduction: log-depth dependence chain so the VLIW
        # packer can co-issue adds, instead of a serial n_taps-deep chain.
        while len(terms) > 1:
            nxt = [terms[i] + terms[i + 1] for i in range(0, len(terms) - 1, 2)]
            if len(terms) % 2:
                nxt.append(terms[-1])
            terms = nxt

        out_ref[...] = terms[0].astype(out_ref.dtype)

    smoother = pl.pallas_call(
        kernel,
        out_shape=jax.ShapeDtypeStruct((1, L), dtype),
        grid=(1,),
        in_specs=[pl.BlockSpec((1, L), lambda i: (0, 0))],
        out_specs=pl.BlockSpec((1, L), lambda i: (0, 0)),
        compiler_params=pltpu.CompilerParams(
            dimension_semantics=("arbitrary",)),
    )

    def forward(tfactor, rank):
        # `rank` is only asserted (kept for API compat with the torch module).
        assert tfactor.shape == (K, R) and rank == R
        x_flat = tfactor.astype(dtype).reshape(1, L)  # layout plumbing only
        return smoother(x_flat).reshape(K, R)

    return forward


def _reference(tfactor, window):
    """Pure-JAX reference matching F.conv2d(..., padding=(window, 0))."""
    taps = jnp.asarray(_gaussian_taps(window), dtype=tfactor.dtype)
    K, R = tfactor.shape
    xpad = jnp.pad(tfactor, ((window, window), (0, 0)))
    out = jnp.zeros((K, R), dtype=tfactor.dtype)
    for j in range(2 * window + 1):
        out = out + taps[j] * xpad[j:j + K, :]
    return out


if __name__ == "__main__":
    window = 3
    K, R = 16, 8  # temporal length x rank (K*R = 128 -> fully lane-dense)

    key = jax.random.PRNGKey(0)
    tfactor = jax.random.normal(key, (K, R), dtype=jnp.float32)

    smooth = make_gaussian_smoothing(window, K, R)
    out = smooth(tfactor, R)
    out = jax.block_until_ready(out)

    ref = _reference(tfactor, window)
    assert out.shape == (K, R)
    np.testing.assert_allclose(np.asarray(out), np.asarray(ref),
                               rtol=1e-5, atol=1e-5)

    print("KERNEL_OK")
</pallas_src>

<mosaic_0001>
module attributes {stable_mosaic.version = 11 : i64} {
  func.func @kernel(%arg0: i32, %arg1: memref<1x128xf32, #tpu.memory_space<vmem>>, %arg2: memref<1x128xf32, #tpu.memory_space<vmem>>) attributes {dimension_semantics = [#tpu.dimension_semantics<arbitrary>], iteration_bounds = array<i64: 1>, scalar_prefetch = 0 : i64, scratch_operands = 0 : i64, tpu.core_type = #tpu.core_type<tc>, window_params = [{pipeline_mode = #tpu.pipeline_mode<synchronous>, transform_indices = @transform_0, window_bounds = array<i64: 1, 128>}, {pipeline_mode = #tpu.pipeline_mode<synchronous>, transform_indices = @transform_1, window_bounds = array<i64: 1, 128>}]} {
    %c0 = arith.constant 0 : index
    %c0_0 = arith.constant 0 : index
    %0 = vector.load %arg1[%c0, %c0_0] : memref<1x128xf32, #tpu.memory_space<vmem>>, vector<1x128xf32>
    %1 = tpu.iota {dimensions = array<i32: 1>} : vector<1x128xi32>
    %c24_i32 = arith.constant 24 : i32
    %2 = tpu.dynamic_rotate %0 by %c24_i32 dim 1 : vector<1x128xf32>, i32 -> vector<1x128xf32>
    %c24_i32_1 = arith.constant 24 : i32
    %3 = vector.broadcast %c24_i32_1 : i32 to vector<1x128xi32>
    %4 = arith.cmpi sge, %1, %3 : vector<1x128xi32>
    %cst = arith.constant 0.000000e+00 : f32
    %5 = vector.broadcast %cst : f32 to vector<1x128xf32>
    %6 = arith.select %4, %2, %5 : vector<1x128xi1>, vector<1x128xf32>
    %cst_2 = arith.constant 0.864665448 : f32
    %7 = vector.broadcast %cst_2 : f32 to vector<1x128xf32>
    %8 = arith.mulf %7, %6 : vector<1x128xf32>
    %c16_i32 = arith.constant 16 : i32
    %9 = tpu.dynamic_rotate %0 by %c16_i32 dim 1 : vector<1x128xf32>, i32 -> vector<1x128xf32>
    %c16_i32_3 = arith.constant 16 : i32
    %10 = vector.broadcast %c16_i32_3 : i32 to vector<1x128xi32>
    %11 = arith.cmpi sge, %1, %10 : vector<1x128xi32>
    %cst_4 = arith.constant 0.000000e+00 : f32
    %12 = vector.broadcast %cst_4 : f32 to vector<1x128xf32>
    %13 = arith.select %11, %9, %12 : vector<1x128xi1>, vector<1x128xf32>
    %cst_5 = arith.constant 0.117019743 : f32
    %14 = vector.broadcast %cst_5 : f32 to vector<1x128xf32>
    %15 = arith.mulf %14, %13 : vector<1x128xf32>
    %c8_i32 = arith.constant 8 : i32
    %16 = tpu.dynamic_rotate %0 by %c8_i32 dim 1 : vector<1x128xf32>, i32 -> vector<1x128xf32>
    %c8_i32_6 = arith.constant 8 : i32
    %17 = vector.broadcast %c8_i32_6 : i32 to vector<1x128xi32>
    %18 = arith.cmpi sge, %1, %17 : vector<1x128xi32>
    %cst_7 = arith.constant 0.000000e+00 : f32
    %19 = vector.broadcast %cst_7 : f32 to vector<1x128xf32>
    %20 = arith.select %18, %16, %19 : vector<1x128xi1>, vector<1x128xf32>
    %cst_8 = arith.constant 1.583690e-02 : f32
    %21 = vector.broadcast %cst_8 : f32 to vector<1x128xf32>
    %22 = arith.mulf %21, %20 : vector<1x128xf32>
    %cst_9 = arith.constant 0.00214329129 : f32
    %23 = vector.broadcast %cst_9 : f32 to vector<1x128xf32>
    %24 = arith.mulf %23, %0 : vector<1x128xf32>
    %c120_i32 = arith.constant 120 : i32
    %25 = tpu.dynamic_rotate %0 by %c120_i32 dim 1 : vector<1x128xf32>, i32 -> vector<1x128xf32>
    %c120_i32_10 = arith.constant 120 : i32
    %26 = vector.broadcast %c120_i32_10 : i32 to vector<1x128xi32>
    %27 = arith.cmpi slt, %1, %26 : vector<1x128xi32>
    %cst_11 = arith.constant 0.000000e+00 : f32
    %28 = vector.broadcast %cst_11 : f32 to vector<1x128xf32>
    %29 = arith.select %27, %25, %28 : vector<1x128xi1>, vector<1x128xf32>
    %cst_12 = arith.constant 2.90062948E-4 : f32
    %30 = vector.broadcast %cst_12 : f32 to vector<1x128xf32>
    %31 = arith.mulf %30, %29 : vector<1x128xf32>
    %c112_i32 = arith.constant 112 : i32
    %32 = tpu.dynamic_rotate %0 by %c112_i32 dim 1 : vector<1x128xf32>, i32 -> vector<1x128xf32>
    %c112_i32_13 = arith.constant 112 : i32
    %33 = vector.broadcast %c112_i32_13 : i32 to vector<1x128xi32>
    %34 = arith.cmpi slt, %1, %33 : vector<1x128xi32>
    %cst_14 = arith.constant 0.000000e+00 : f32
    %35 = vector.broadcast %cst_14 : f32 to vector<1x128xf32>
    %36 = arith.select %34, %32, %35 : vector<1x128xi1>, vector<1x128xf32>
    %cst_15 = arith.constant 3.92557486E-5 : f32
    %37 = vector.broadcast %cst_15 : f32 to vector<1x128xf32>
    %38 = arith.mulf %37, %36 : vector<1x128xf32>
    %c104_i32 = arith.constant 104 : i32
    %39 = tpu.dynamic_rotate %0 by %c104_i32 dim 1 : vector<1x128xf32>, i32 -> vector<1x128xf32>
    %c104_i32_16 = arith.constant 104 : i32
    %40 = vector.broadcast %c104_i32_16 : i32 to vector<1x128xi32>
    %41 = arith.cmpi slt, %1, %40 : vector<1x128xi32>
    %cst_17 = arith.constant 0.000000e+00 : f32
    %42 = vector.broadcast %cst_17 : f32 to vector<1x128xf32>
    %43 = arith.select %41, %39, %42 : vector<1x128xi1>, vector<1x128xf32>
    %cst_18 = arith.constant 5.31268824E-6 : f32
    %44 = vector.broadcast %cst_18 : f32 to vector<1x128xf32>
    %45 = arith.mulf %44, %43 : vector<1x128xf32>
    %46 = arith.addf %8, %15 : vector<1x128xf32>
    %47 = arith.addf %22, %24 : vector<1x128xf32>
    %48 = arith.addf %31, %38 : vector<1x128xf32>
    %49 = arith.addf %46, %47 : vector<1x128xf32>
    %50 = arith.addf %48, %45 : vector<1x128xf32>
    %51 = arith.addf %49, %50 : vector<1x128xf32>
    %c0_19 = arith.constant 0 : index
    %c0_20 = arith.constant 0 : index
    %52 = vector.load %arg2[%c0_19, %c0_20] : memref<1x128xf32, #tpu.memory_space<vmem>>, vector<1x128xf32>
    tpu.vector_store %arg2[%c0_19, %c0_20], %51 {strides = array<i32>} : memref<1x128xf32, #tpu.memory_space<vmem>>, vector<1x128xf32>,
    return
  }
  func.func @transform_0(%arg0: i32) -> (i32, i32) {
    %c0_i32 = arith.constant 0 : i32
    %c0_i32_0 = arith.constant 0 : i32
    %c0_i32_1 = arith.constant 0 : i32
    return %c0_i32, %c0_i32_0 : i32, i32
  }
  func.func @transform_1(%arg0: i32) -> (i32, i32) {
    %c0_i32 = arith.constant 0 : i32
    %c0_i32_0 = arith.constant 0 : i32
    %c0_i32_1 = arith.constant 0 : i32
    return %c0_i32, %c0_i32_0 : i32, i32
  }
}

</mosaic_0001>

<bundles_post_ra>
// kernel: tpu_custom_call.1
= control target key start
LH: loop header
LB: loop body
LE: loop exit
PB: predicated region body
PF: predicated region fallthrough
CT: control target
= control target key end

     0   :  { %6 = vsyncpa [#allocation3], 0  ;;  %s175_s0 = inlined_call_operand.hbm [shape: f32[1,128], index: 0, kind: input, shape index: {}]   ;;  %s176_s1 = inlined_call_operand.hbm [shape: f32[1,128], index: 1, kind: output, shape index: {}]  }
   0x1   :  { %7 = vsyncpa [#allocation4], 0  ;;  %s133_s6 = smov [#allocation2]   ;;  %s85_s10 = scalar_lea.hbm %s175_s0, 16 }
   0x2   :  { %s14_s7 = sshll.u32 %s133_s6, 4  ;;  %p86_p0 = scmp.ne.s32.totalorder %s175_s0, %s85_s10  ;;  %s15_s7 = int_to_ptr.vmem [resolvable:$true] %s14_s7 }
   0x3   :  { %p89_p1 = scmp.lt.u32.totalorder %s85_s10, %s175_s0 }
   0x5   :  { %p91_p2 = pnand %p89_p1, %p86_p0 }
   0x7   :  { %94 = shalt.err (!%p91_p2)
}
   0x8   :  { %s95_s15 = scalar_lea.vmem %s15_s7, 16  ;;  %s99_s16 = scalar_lea.vmem %s15_s7, 32 }
   0x9   :  { %p96_p3 = scmp.ne.s32.totalorder %s15_s7, %s95_s15  ;;  %p100_p4 = scmp.lt.s32.totalorder %s15_s7, %s15_s7 }
   0xa   :  { %p101_p5 = scmp.lt.s32.totalorder %s99_s16, %s95_s15 }
   0xc   :  { %p102_p6 = por %p101_p5, %p100_p4 }
   0xe   :  { %p103_p7 = pnand %p102_p6, %p96_p3 }
  0x10   :  { %106 = shalt.err (!%p103_p7)
}
  0x11   :  { %17 = dma.hbm_to_vmem [thread:$0]  %s175_s0, 16, %s15_s7, [#allocation3]  }
  0x12   :  { %129 = dma.done.wait [#allocation3], 16  }
  0x13   :  { %130 = vsyncadd [#allocation3], 4294967280  ;;  %v21_v0 = vld [vmem:[#allocation2] sm:$0x1]  ;;  %s134_s19 = smov 24   ;;  %s135_s20 = smov 8   ;;  %v22_v1 = vlaneseq }
  0x14   :  { %24 = vrot.lane.b32.xlu0 %v21_v0, %s134_s19  ;;  %34 = vrot.lane.b32.xlu1 %v21_v0, %s135_s20  ;;  %s136_s21 = smov 16   ;;  %s137_s22 = smov 120   ;;  %v39_v14 = vmul.f32 0.0021432913, %v21_v0 }
  0x15   :  { %s138_s23 = smov 112   ;;  %s139_s24 = smov 104   ;;  %v23_v2 = vand.u32 127, %v22_v1 }
  0x16   :  { %s140_s0 = smov [#allocation5]  }
  0x17   :  { %vm26_vm0 = vcmp.ge.s32.totalorder %v23_v2, 24  ;;  %vm36_vm1 = vcmp.ge.s32.totalorder %v23_v2, 8  ;;  %vm31_vm2 = vcmp.ge.s32.totalorder %v23_v2, 16  ;;  %vm42_vm3 = vcmp.lt.s32.totalorder %v23_v2, 120  ;;  %s68_s25 = sshll.u32 %s140_s0, 4  ;;  %s69_s25 = int_to_ptr.vmem [resolvable:$true] %s68_s25 }
  0x18   :  { %29 = vrot.lane.b32.xlu0 %v21_v0, %s136_s21  ;;  %40 = vrot.lane.b32.xlu1 %v21_v0, %s137_s22  ;;  %vm47_vm4 = vcmp.lt.s32.totalorder %v23_v2, 112  ;;  %vm52_vm5 = vcmp.lt.s32.totalorder %v23_v2, 104  ;;  %s107_s26 = scalar_lea.vmem %s69_s25, 16  ;;  %s111_s27 = scalar_lea.vmem %s69_s25, 32 }
  0x19   :  { %p108_p8 = scmp.ne.s32.totalorder %s69_s25, %s107_s26  ;;  %p112_p9 = scmp.lt.s32.totalorder %s69_s25, %s69_s25 }
  0x1a   :  { %p113_p10 = scmp.lt.s32.totalorder %s111_s27, %s107_s26 }
  0x1c   :  { %45 = vrot.lane.b32.xlu0 %v21_v0, %s138_s23  ;;  %50 = vrot.lane.b32.xlu1 %v21_v0, %s139_s24  ;;  %p114_p11 = por %p113_p10, %p112_p9 }
  0x1e   :  { %p115_p12 = pnand %p114_p11, %p108_p8 }
  0x86   :  { %v25_v3 = vpop.permute.xlu0 %24  ;;  %v35_v4 = vpop.permute.xlu1 %34 }
  0x87   :  { %v27_v7 = vsel %vm26_vm0, %v25_v3, 0.0  ;;  %v37_v8 = vsel %vm36_vm1, %v35_v4, 0.0 }
  0x88   :  { %v28_v12 = vmul.f32 0.86466545, %v27_v7  ;;  %v38_v13 = vmul.f32 0.0158369, %v37_v8 }
  0x8a   :  { %v30_v5 = vpop.permute.xlu0 %29  ;;  %v41_v6 = vpop.permute.xlu1 %40  ;;  %v56_v23 = vadd.f32 %v39_v14, %v38_v13 }
  0x8b   :  { %v32_v9 = vsel %vm31_vm2, %v30_v5, 0.0  ;;  %v43_v11 = vsel %vm42_vm3, %v41_v6, 0.0 }
  0x8c   :  { %v33_v10 = vmul.f32 0.11701974, %v32_v9  ;;  %v44_v20 = vmul.f32 0.00029006295, %v43_v11 }
  0x8e   :  { %v46_v15 = vpop.permute.xlu0 %45  ;;  %v51_v16 = vpop.permute.xlu1 %50  ;;  %v55_v19 = vadd.f32 %v33_v10, %v28_v12 }
  0x8f   :  { %v48_v17 = vsel %vm47_vm4, %v46_v15, 0.0  ;;  %v53_v18 = vsel %vm52_vm5, %v51_v16, 0.0 }
  0x90   :  { %v49_v21 = vmul.f32 3.925575e-05, %v48_v17  ;;  %v54_v22 = vmul.f32 5.3126882e-06, %v53_v18  ;;  %v58_v25 = vadd.f32 %v56_v23, %v55_v19 }
  0x92   :  { %v57_v24 = vadd.f32 %v49_v21, %v44_v20 }
  0x94   :  { %v59_v26 = vadd.f32 %v57_v24, %v54_v22 }
  0x96   :  { %v60_v27 = vadd.f32 %v59_v26, %v58_v25 }
  0x98   :  { %61 = vst [vmem:[#allocation5] sm:$0x1] %v60_v27 }
  0x99   :  { %118 = shalt.err (!%p115_p12)
}
  0x9a   :  { %s119_s30 = scalar_lea.hbm %s176_s1, 16 }
  0x9b   :  { %p120_p13 = scmp.ne.s32.totalorder %s176_s1, %s119_s30  ;;  %p123_p0 = scmp.lt.u32.totalorder %s119_s30, %s176_s1 }
  0x9d   :  { %p125_p1 = pnand %p123_p0, %p120_p13 }
  0x9f   :  { %128 = shalt.err (!%p125_p1)
}
  0xa0   :  { %71 = dma.vmem_to_hbm [thread:$0]  %s69_s25, 16, %s176_s1, [#allocation4]  }
  0xa1   :  { %131 = dma.done.wait [#allocation4], 16  }
  0xa2   :  { %132 = vsyncadd [#allocation4], 4294967280 }
  0xa3   :  { %75 = vsyncpa [#allocation3], 1 }
  0xa4   :  { %76 = vsyncpa [#allocation4], 1 }

</bundles_post_ra>
